<compile_context>
chip_gen: v6e
topology: v6e:2x2x1
jax: 0.10.0
libtpu: 0.0.40
codegen_flags: <defaults>
</compile_context>

<pallas_src>
import functools

import jax
import jax.numpy as jnp
from jax.experimental import pallas as pl
from jax.experimental.pallas import tpu as pltpu


def _round_up(x, m):
    return ((x + m - 1) // m) * m


def _cdiv(a, b):
    return -(-a // b)


# ---------------------------------------------------------------------------
# Kernels
# ---------------------------------------------------------------------------
def _unembed_kernel(x_ref, w_ref, b_ref, o_ref):
    """One (tm, tv) output tile: full-depth (tm, D) @ (D, tv) + bias."""
    acc = jnp.dot(x_ref[...], w_ref[...], preferred_element_type=jnp.float32)
    o_ref[...] = (acc + b_ref[...].astype(jnp.float32)).astype(o_ref.dtype)


def _unembed_kernel_ktiled(x_ref, w_ref, b_ref, o_ref, acc_ref):
    """K-tiled path: accumulate (tm, tv) f32 partials over the d_model axis."""
    k = pl.program_id(2)

    @pl.when(k == 0)
    def _():
        acc_ref[...] = jnp.zeros_like(acc_ref)

    acc_ref[...] += jnp.dot(x_ref[...], w_ref[...],
                            preferred_element_type=jnp.float32)

    @pl.when(k == pl.num_programs(2) - 1)
    def _():
        o_ref[...] = (acc_ref[...] + b_ref[...].astype(jnp.float32)
                      ).astype(o_ref.dtype)


# ---------------------------------------------------------------------------
# Generation-aware VMEM / tile sizing
# ---------------------------------------------------------------------------
@functools.lru_cache(maxsize=1)
def _vmem_config():
    """(tile_budget_bytes, vmem_limit_bytes, big_vmem) for the local TPU."""
    mib = 1024 * 1024
    try:
        cap = int(pltpu.get_tpu_info().vmem_capacity_bytes)
    except Exception:
        cap = 0
    if cap <= 0:
        cap = 64 * mib                       # conservative default (v7x-class VMEM)
    # Leave compiler headroom: never request the full physical VMEM.
    vmem_limit = max(min(int(cap * 0.84), cap - 8 * mib), min(cap, 32 * mib))
    budget = max(int(cap * 0.70), min(cap, 24 * mib))
    big_vmem = cap >= 96 * mib               # v5e/v6e (128 MiB) vs v7x (64 MiB)
    return budget, vmem_limit, big_vmem


def _largest_k_tile(d_model, cap):
    """Largest multiple of 128 that divides d_model and is <= cap (None if none)."""
    best = None
    t = 128
    while t <= min(d_model, cap):
        if d_model % t == 0:
            best = t
        t += 128
    return best


def _choose_tiles(m, d_model, d_vocab, xb, wb, bb, ob, budget, big_vmem):
    """Pick (tm, tv, tk).  tk == d_model means the depth dim is not tiled."""
    # dtype-aware sublane rounding: bf16 packs 2 rows / sublane, int8/fp8 pack 4.
    sub = 32 if xb == 1 else (16 if xb == 2 else 8)
    tv_cap = 8192 if big_vmem else 4096
    if m >= 512 and big_vmem:
        tm = 512                            # 2 passes on 256-wide MXUs
    elif m >= 256:
        tm = 256                            # matches v6e/v7x MXU M dimension
    else:
        tm = _round_up(m, sub)
    v_full = _round_up(d_vocab, 128)

    def fullk_tv_max(tm_):
        # Full-K accounting: x double-buffered, W single-buffered (resident ->
        # pl.Buffered(1)), bias/output double-buffered, plus ~2 (tm, tv) f32
        # intermediates for the dot + bias-add epilogue.
        fixed = 2 * tm_ * d_model * xb
        per_lane = d_model * wb + 2 * bb + 2 * tm_ * ob + 2 * tm_ * 4
        return (budget - fixed) // per_lane

    tv_max = fullk_tv_max(tm)

    if d_model % 128 == 0 and tv_max < min(512, v_full):
        # K-tiled fallback (very large d_model): keep (tm, tv) large and
        # accumulate in an f32 VMEM scratch instead of collapsing tv.
        tv = min(2048, tv_cap, v_full)
        tk = None
        while True:
            fixed = 2 * tv * bb + 2 * tm * tv * ob + 3 * tm * tv * 4
            per_k = 2 * tm * xb + 2 * tv * wb       # both operands streamed
            tk_max = (budget - fixed) // per_k
            tk = _largest_k_tile(d_model, tk_max)
            if tk is not None or tv <= 128:
                break
            tv = max(128, ((tv // 2) // 128) * 128)
        if tk is None:
            tk = 128                                # d_model % 128 == 0 here
        return tm, tv, tk

    # Full-depth path.  If even tv=128 does not fit, shrink tm (only reachable
    # for huge d_model that is not a multiple of 128, where K-tiling is unsafe).
    while tv_max < 128 and tm > sub:
        tm = max(sub, _round_up(tm // 2, sub))
        tv_max = fullk_tv_max(tm)
    tv = max(128, min((max(tv_max, 128) // 128) * 128, tv_cap, v_full))
    return tm, tv, d_model


# ---------------------------------------------------------------------------
# Wrapper
# ---------------------------------------------------------------------------
@functools.partial(jax.jit, static_argnames=("out_dtype", "tm", "tv", "tk"))
def unembed(x, w_u, b_u, *, out_dtype=jnp.float32, tm=None, tv=None, tk=None):
    """x: [batch, pos, d_model], w_u: [d_model, d_vocab], b_u: [d_vocab]."""
    batch, pos, d_model = x.shape
    d_model_w, d_vocab = w_u.shape
    assert d_model_w == d_model
    m = batch * pos

    xb = jnp.dtype(x.dtype).itemsize
    wb = jnp.dtype(w_u.dtype).itemsize
    bb = jnp.dtype(b_u.dtype).itemsize
    ob = jnp.dtype(out_dtype).itemsize

    budget, vmem_limit, big_vmem = _vmem_config()
    auto_tm, auto_tv, auto_tk = _choose_tiles(
        m, d_model, d_vocab, xb, wb, bb, ob, budget, big_vmem)
    tm = auto_tm if tm is None else tm
    tv = auto_tv if tv is None else tv
    tk = auto_tk if tk is None else tk

    assert tm % 8 == 0, "tm must be a multiple of 8"
    assert tv % 128 == 0, "tv must be a multiple of 128"
    assert tk == d_model or (tk % 128 == 0 and d_model % tk == 0), (
        "K tiling requires tk % 128 == 0 and tk | d_model")

    x2d = x.reshape(m, d_model)          # free view (contiguous collapse)
    b2d = b_u.reshape(1, d_vocab)        # free; streamed in its stored dtype

    gm = _cdiv(m, tm)
    gv = _cdiv(d_vocab, tv)

    if tk == d_model:
        # ------- full-depth K: one MXU matmul per tile, no accumulator -------
        # Byte-accurate traffic model; constant-index blocks are read once.
        w_restream = gm if gv > 1 else 1
        x_restream = gv if gm > 1 else 1
        cost_m_outer = m * d_model * xb + w_restream * d_model * d_vocab * wb
        cost_v_outer = x_restream * m * d_model * xb + d_model * d_vocab * wb
        # Ties -> vocab-outer so megacore (v7x) shards the V axis.
        m_outer = cost_m_outer < cost_v_outer

        # Safety shrink so the chosen buffering always fits the tile budget.
        def _usage(tv_):
            x_bufs = 1 if m_outer else 2
            w_bufs = 2 if m_outer else 1
            return (x_bufs * tm * d_model * xb + w_bufs * d_model * tv_ * wb
                    + 2 * tv_ * bb + 2 * tm * tv_ * ob + 2 * tm * tv_ * 4)
        while tv > 128 and _usage(tv) > budget:
            tv -= 128
        gv = _cdiv(d_vocab, tv)

        resident = pl.Buffered(1)        # resident operand: single buffer
        if m_outer:
            grid = (gm, gv)
            x_spec = pl.BlockSpec((tm, d_model), lambda i, j: (i, 0),
                                  pipeline_mode=resident)
            w_spec = pl.BlockSpec((d_model, tv), lambda i, j: (0, j))
            b_spec = pl.BlockSpec((1, tv), lambda i, j: (0, j))
            o_spec = pl.BlockSpec((tm, tv), lambda i, j: (i, j))
        else:
            grid = (gv, gm)
            x_spec = pl.BlockSpec((tm, d_model), lambda j, i: (i, 0))
            w_spec = pl.BlockSpec((d_model, tv), lambda j, i: (0, j),
                                  pipeline_mode=resident)
            b_spec = pl.BlockSpec((1, tv), lambda j, i: (0, j))
            o_spec = pl.BlockSpec((tm, tv), lambda j, i: (i, j))

        out2d = pl.pallas_call(
            _unembed_kernel,
            out_shape=jax.ShapeDtypeStruct((m, d_vocab), out_dtype),
            grid_spec=pltpu.PrefetchScalarGridSpec(
                num_scalar_prefetch=0,
                grid=grid,
                in_specs=[x_spec, w_spec, b_spec],
                out_specs=o_spec,
            ),
            compiler_params=pltpu.CompilerParams(
                dimension_semantics=("parallel", "parallel"),
                vmem_limit_bytes=vmem_limit,
            ),
        )(x2d, w_u, b2d)
    else:
        # ------- K-tiled fallback: f32 accumulator scratch, K axis last -------
        gk = d_model // tk
        grid = (gv, gm, gk)
        out2d = pl.pallas_call(
            _unembed_kernel_ktiled,
            out_shape=jax.ShapeDtypeStruct((m, d_vocab), out_dtype),
            grid_spec=pltpu.PrefetchScalarGridSpec(
                num_scalar_prefetch=0,
                grid=grid,
                in_specs=[
                    pl.BlockSpec((tm, tk), lambda j, i, k: (i, k)),
                    pl.BlockSpec((tk, tv), lambda j, i, k: (k, j)),
                    pl.BlockSpec((1, tv), lambda j, i, k: (0, j)),
                ],
                out_specs=pl.BlockSpec((tm, tv), lambda j, i, k: (i, j)),
                scratch_shapes=[pltpu.VMEM((tm, tv), jnp.float32)],
            ),
            compiler_params=pltpu.CompilerParams(
                dimension_semantics=("parallel", "parallel", "arbitrary"),
                vmem_limit_bytes=vmem_limit,
            ),
        )(x2d, w_u, b2d)

    return out2d.reshape(batch, pos, d_vocab)


# ---------------------------------------------------------------------------
# Self-test
# ---------------------------------------------------------------------------
if __name__ == "__main__":
    HIGH = jax.lax.Precision.HIGHEST
    init_range = 0.02
    key = jax.random.PRNGKey(0)
    k1, k2, k3, k4, k5, k6 = jax.random.split(key, 6)

    # --- A: module-sized config, auto tiles, f32, zero bias (matches init). ---
    batch, pos, d_model, d_vocab = 2, 8, 32, 256
    x = jax.random.normal(k1, (batch, pos, d_model), dtype=jnp.float32)
    w_u = init_range * jax.random.normal(k2, (d_model, d_vocab), dtype=jnp.float32)
    b_u = jnp.zeros((d_vocab,), dtype=jnp.float32)
    out = jax.block_until_ready(unembed(x, w_u, b_u))
    ref = jnp.einsum("bpd,dv->bpv", x, w_u, precision=HIGH) + b_u
    assert out.shape == (batch, pos, d_vocab) and out.dtype == jnp.float32
    assert jnp.allclose(out, ref, atol=1e-4, rtol=1e-4)

    # --- B: ragged M and V boundary blocks (no host-side pad/slice); forced
    #        small tiles exercise masked boundaries + Buffered(1) resident W. ---
    batch, pos, d_model, d_vocab = 2, 7, 32, 200
    x = jax.random.normal(k3, (batch, pos, d_model), dtype=jnp.float32)
    w_u = init_range * jax.random.normal(k4, (d_model, d_vocab), dtype=jnp.float32)
    b_u = 0.1 * jax.random.normal(k5, (d_vocab,), dtype=jnp.float32)
    out = jax.block_until_ready(unembed(x, w_u, b_u, tm=8, tv=128))
    ref = jnp.einsum("bpd,dv->bpv", x, w_u, precision=HIGH) + b_u
    assert out.shape == (batch, pos, d_vocab)
    assert jnp.allclose(out, ref, atol=1e-4, rtol=1e-4)

    # --- C: K-tiled accumulator fallback (forced tk < d_model). ---
    batch, pos, d_model, d_vocab = 2, 8, 256, 512
    x = jax.random.normal(k6, (batch, pos, d_model), dtype=jnp.float32)
    w_u = init_range * jax.random.normal(k2, (d_model, d_vocab), dtype=jnp.float32)
    b_u = 0.1 * jax.random.normal(k5, (d_vocab,), dtype=jnp.float32)
    out = jax.block_until_ready(unembed(x, w_u, b_u, tk=128))
    ref = jnp.einsum("bpd,dv->bpv", x, w_u, precision=HIGH) + b_u
    assert jnp.allclose(out, ref, atol=1e-4, rtol=1e-4)

    # --- D: M-outer loop order branch with Buffered(1) resident x. ---
    batch, pos, d_model, d_vocab = 4, 128, 32, 256
    x = jax.random.normal(k3, (batch, pos, d_model), dtype=jnp.float32)
    w_u = init_range * jax.random.normal(k4, (d_model, d_vocab), dtype=jnp.float32)
    b_u = 0.1 * jax.random.normal(k5, (d_vocab,), dtype=jnp.float32)
    out = jax.block_until_ready(unembed(x, w_u, b_u, tm=256, tv=128))
    ref = jnp.einsum("bpd,dv->bpv", x, w_u, precision=HIGH) + b_u
    assert jnp.allclose(out, ref, atol=1e-4, rtol=1e-4)

    # --- E: bf16 streaming of x / W_U, f32 accumulation, f32 logits out. ---
    batch, pos, d_model, d_vocab = 2, 8, 32, 256
    x = jax.random.normal(k1, (batch, pos, d_model), dtype=jnp.float32)
    w_u = init_range * jax.random.normal(k2, (d_model, d_vocab), dtype=jnp.float32)
    b_u = jnp.zeros((d_vocab,), dtype=jnp.float32)
    ref = jnp.einsum("bpd,dv->bpv", x, w_u, precision=HIGH) + b_u
    out_bf16 = jax.block_until_ready(
        unembed(x.astype(jnp.bfloat16), w_u.astype(jnp.bfloat16), b_u))
    assert out_bf16.dtype == jnp.float32
    assert jnp.allclose(out_bf16, ref, atol=5e-2, rtol=5e-2)

    print("KERNEL_OK")
</pallas_src>

<mosaic_0001>
module attributes {stable_mosaic.version = 11 : i64} {
  func.func @_unembed_kernel(%arg0: i32, %arg1: i32, %arg2: memref<16x32xf32, #tpu.memory_space<vmem>>, %arg3: memref<32x256xf32, #tpu.memory_space<vmem>>, %arg4: memref<1x256xf32, #tpu.memory_space<vmem>>, %arg5: memref<16x256xf32, #tpu.memory_space<vmem>>) attributes {dimension_semantics = [#tpu.dimension_semantics<parallel>, #tpu.dimension_semantics<parallel>], iteration_bounds = array<i64: 1, 1>, scalar_prefetch = 0 : i64, scratch_operands = 0 : i64, tpu.core_type = #tpu.core_type<tc>, window_params = [{transform_indices = @transform_0, window_bounds = array<i64: 16, 32>}, {pipeline_mode = #tpu.pipeline_mode<synchronous>, transform_indices = @transform_1, window_bounds = array<i64: 32, 256>}, {transform_indices = @transform_2, window_bounds = array<i64: 1, 256>}, {transform_indices = @transform_3, window_bounds = array<i64: 16, 256>}]} {
    %c0 = arith.constant 0 : index
    %c0_0 = arith.constant 0 : index
    %0 = vector.load %arg2[%c0, %c0_0] : memref<16x32xf32, #tpu.memory_space<vmem>>, vector<16x32xf32>
    %c0_1 = arith.constant 0 : index
    %c0_2 = arith.constant 0 : index
    %1 = vector.load %arg3[%c0_1, %c0_2] : memref<32x256xf32, #tpu.memory_space<vmem>>, vector<32x256xf32>
    %cst = arith.constant dense<0.000000e+00> : vector<16x256xf32>
    %2 = tpu.matmul %0, %1, %cst {dimension_numbers = #tpu.dot_dimension_numbers<[1], [0], [0], [1], [0, 0, 1, 1], [], []>} : vector<16x32xf32>, vector<32x256xf32>, vector<16x256xf32> -> vector<16x256xf32>
    %c0_3 = arith.constant 0 : index
    %c0_4 = arith.constant 0 : index
    %3 = vector.load %arg4[%c0_3, %c0_4] : memref<1x256xf32, #tpu.memory_space<vmem>>, vector<1x256xf32>
    %4 = vector.broadcast %3 : vector<1x256xf32> to vector<16x256xf32>
    %5 = arith.addf %2, %4 : vector<16x256xf32>
    %c0_5 = arith.constant 0 : index
    %c0_6 = arith.constant 0 : index
    %6 = vector.load %arg5[%c0_5, %c0_6] : memref<16x256xf32, #tpu.memory_space<vmem>>, vector<16x256xf32>
    tpu.vector_store %arg5[%c0_5, %c0_6], %5 {strides = array<i32>} : memref<16x256xf32, #tpu.memory_space<vmem>>, vector<16x256xf32>,
    return
  }
  func.func @transform_0(%arg0: i32, %arg1: i32) -> (i32, i32) {
    %c0_i32 = arith.constant 0 : i32
    %c0_i32_0 = arith.constant 0 : i32
    return %arg1, %c0_i32 : i32, i32
  }
  func.func @transform_1(%arg0: i32, %arg1: i32) -> (i32, i32) {
    %c0_i32 = arith.constant 0 : i32
    %c0_i32_0 = arith.constant 0 : i32
    return %c0_i32, %arg0 : i32, i32
  }
  func.func @transform_2(%arg0: i32, %arg1: i32) -> (i32, i32) {
    %c0_i32 = arith.constant 0 : i32
    %c0_i32_0 = arith.constant 0 : i32
    return %c0_i32, %arg0 : i32, i32
  }
  func.func @transform_3(%arg0: i32, %arg1: i32) -> (i32, i32) {
    %c0_i32 = arith.constant 0 : i32
    return %arg1, %arg0 : i32, i32
  }
}

</mosaic_0001>

<bundles_post_ra>
// kernel: unembed.1
= control target key start
LH: loop header
LB: loop body
LE: loop exit
PB: predicated region body
PF: predicated region fallthrough
CT: control target
= control target key end

     0   :  { %8 = vsyncpa [#allocation3], 0  ;;  %s301_s0 = inlined_call_operand.hbm [shape: f32[16,32], index: 0, kind: input, shape index: {}]   ;;  %s302_s1 = inlined_call_operand.hbm [shape: f32[32,256], index: 1, kind: input, shape index: {}]   ;;  %s303_s2 = inlined_call_operand.vmem [shape: f32[1,256], index: 2, kind: input, shape index: {}]   ;;  %s304_s3 = inlined_call_operand.hbm [shape: f32[16,256], index: 3, kind: output, shape index: {}]  }
   0x1   :  { %9 = vsyncpa [#allocation6], 0 }
   0x2   :  { %10 = vsyncpa [#allocation4], 0  ;;  %s255_s12 = smov [#allocation2]  }
   0x3   :  { %s16_s13 = sshll.u32 %s255_s12, 4  ;;  %s17_s13 = int_to_ptr.vmem [resolvable:$true] %s16_s13 }
   0x4   :  { %s197_s14 = scalar_lea.vmem %s17_s13, 256  ;;  %p202_p1 = scmp.lt.s32.totalorder %s17_s13, %s17_s13 }
   0x5   :  { %p198_p0 = scmp.ne.s32.totalorder %s17_s13, %s197_s14  ;;  %p203_p2 = scmp.lt.s32.totalorder %s197_s14, %s197_s14 }
   0x7   :  { %p204_p3 = por %p203_p2, %p202_p1 }
   0x9   :  { %p205_p4 = pnand %p204_p3, %p198_p0 }
   0xb   :  { %208 = shalt.err (!%p205_p4)
}
   0xc   :  { %s256_s15 = smov 128   ;;  %s257_s16 = smov 8  }
   0xd   :  { %22 = dma.hbm_to_vmem [thread:$0]  %s301_s0, 256, %s17_s13, [#allocation3], %s256_s15, %s256_s15, %s257_s16  }
   0xe   :  { %s258_s19 = smov [#allocation5]  }
   0xf   :  { %s28_s20 = sshll.u32 %s258_s19, 4  ;;  %s29_s20 = int_to_ptr.vmem [resolvable:$true] %s28_s20 }
  0x10   :  { %s217_s21 = scalar_lea.vmem %s29_s20, 1024  ;;  %p222_p6 = scmp.lt.s32.totalorder %s29_s20, %s29_s20 }
  0x11   :  { %p218_p5 = scmp.ne.s32.totalorder %s29_s20, %s217_s21  ;;  %p223_p7 = scmp.lt.s32.totalorder %s217_s21, %s217_s21 }
  0x13   :  { %p224_p8 = por %p223_p7, %p222_p6 }
  0x15   :  { %p225_p9 = pnand %p224_p8, %p218_p5 }
  0x17   :  { %228 = shalt.err (!%p225_p9)
}
  0x18   :  { %s259_s22 = smov 256   ;;  %s260_s23 = smov 16  }
  0x19   :  { %34 = dma.hbm_to_vmem [thread:$0]  %s302_s1, 1024, %s29_s20, [#allocation6], %s259_s22, %s259_s22, %s260_s23  }
  0x1a   :  { %249 = dma.done.wait [#allocation3], 256  }
  0x1b   :  { %250 = vsyncadd [#allocation3], 4294967040 }
  0x1c   :  { %251 = dma.done.wait [#allocation6], 1024  }
  0x1d   :  { %252 = vsyncadd [#allocation6], 4294966272  ;;  %v261_v0 = vmov 0.0   ;;  %v52_v1 = vld [vmem:[#allocation5 + $0x38] sm:$0xff]  ;;  %v51_v2 = vld [vmem:[#allocation5 + $0x30] sm:$0xff]  ;;  %vm65_vm0 = vcmask 261120   ;;  %v55_v11 = vlaneseq }
  0x1e   :  { %136 = vmatprep.mubr.f32.mxu0 %v261_v0  ;;  %142 = vmatprep.mubr.f32.mxu1 %v261_v0  ;;  %v50_v3 = vld [vmem:[#allocation5 + $0x28] sm:$0xff]  ;;  %v49_v4 = vld [vmem:[#allocation5 + $0x20] sm:$0xff]  ;;  %v48_v5 = vld [vmem:[#allocation5 + $0x18] sm:$0xff]  ;;  %s262_s26 = smov [#allocation7]  }
  0x1f   :  { %96 = vmatprep.subr.mxu0 %v52_v1  ;;  %173 = vmatprep.subr.mxu1 %v52_v1  ;;  %v47_v6 = vld [vmem:[#allocation5 + $0x10] sm:$0xff]  ;;  %v46_v7 = vld [vmem:[#allocation5 + $0x8] sm:$0xff]  ;;  %v45_v8 = vld [vmem:[#allocation5] sm:$0xff]  ;;  %v56_v12 = vshrl.u32 %v55_v11, 7  ;;  %s158_s27 = sshll.u32 %s262_s26, 4  ;;  %s159_s27 = int_to_ptr.vmem [resolvable:$true] %s158_s27 }
  0x20   :  { %97 = vmatpush1.msra.mxu0 %v51_v2  ;;  %177 = vmatpush1.msra.mxu1 %v51_v2  ;;  %v43_v9 = vld [vmem:[#allocation2] sm:$0xff]  ;;  %v44_v10 = vld [vmem:[#allocation2 + $0x8] sm:$0xff]  ;;  %s229_s28 = scalar_lea.vmem %s159_s27, 512  ;;  %p234_p11 = scmp.lt.s32.totalorder %s159_s27, %s159_s27 }
  0x21   :  { %98 = vmatprep.subr.mxu0 %v50_v3  ;;  %174 = vmatprep.subr.mxu1 %v50_v3  ;;  %v57_v13 = vsub.s32 0, %v56_v12  ;;  %v53_v14 = vld [vmem:[%s303_s2] sm:$0x3]  ;;  %v61_v15 = vsub.s32 1, %v56_v12  ;;  %p230_p10 = scmp.ne.s32.totalorder %s159_s27, %s229_s28  ;;  %p235_p12 = scmp.lt.s32.totalorder %s229_s28, %s229_s28 }
  0x22   :  { %99 = vmatpush1.msra.mxu0 %v49_v4  ;;  %178 = vmatpush1.msra.mxu1 %v49_v4 }
  0x23   :  { %100 = vmatprep.subr.mxu0 %v48_v5  ;;  %175 = vmatprep.subr.mxu1 %v48_v5  ;;  %v58_v16 = vrot.slane %v53_v14, %v57_v13  ;;  %v62_v17 = vrot.slane %v53_v14, %v61_v15  ;;  %p236_p13 = por %p235_p12, %p234_p11 }
  0x24   :  { %101 = vmatpush1.msra.mxu0 %v47_v6  ;;  %179 = vmatpush1.msra.mxu1 %v47_v6 }
  0x25   :  { %102 = vmatprep.subr.mxu0 %v46_v7  ;;  %176 = vmatprep.subr.mxu1 %v46_v7  ;;  %p237_p0 = pnand %p236_p13, %p230_p10 }
  0x26   :  { %103 = vmatpush1.msra.mxu0 %v45_v8  ;;  %180 = vmatpush1.msra.mxu1 %v45_v8 }
  0x27   :  { %171 = vmatmul.mubr.msk.f32.vlgmr.msra.gmra.mxu0 %vm65_vm0, %v43_v9  ;;  %172 = vmatmul.mubr.msk.f32.vlgmr.msra.gmra.mxu1 %vm65_vm0, %v44_v10 }
  0xe7   :  { %v138_v18 = vpop.f32.mrf.mxu0  ;;  %v144_v19 = vpop.f32.mrf.mxu1 }
  0xe8   :  { %v139_v20 = vadd.f32 %v138_v18, %v58_v16  ;;  %v145_v21 = vadd.f32 %v144_v19, %v58_v16 }
  0xe9   :  { %v140_v22 = vpop.f32.mrf.mxu0  ;;  %v146_v23 = vpop.f32.mrf.mxu1 }
  0xea   :  { %149 = vst [vmem:[#allocation7] sm:$0xff] %v139_v20  ;;  %151 = vst [vmem:[#allocation7 + $0x10] sm:$0xff] %v145_v21  ;;  %v141_v24 = vadd.f32 %v140_v22, %v62_v17  ;;  %v147_v25 = vadd.f32 %v146_v23, %v62_v17 }
  0xec   :  { %150 = vst [vmem:[#allocation7 + $0x8] sm:$0xff] %v141_v24  ;;  %152 = vst [vmem:[#allocation7 + $0x18] sm:$0xff] %v147_v25 }
  0xed   :  { %240 = shalt.err (!%p237_p0)
}
  0xee   :  { %164 = dma.vmem_to_hbm [thread:$0]  %s159_s27, 512, %s304_s3, [#allocation4], %s259_s22, %s259_s22, %s260_s23  }
  0xef   :  { %253 = dma.done.wait [#allocation4], 512  }
  0xf0   :  { %254 = vsyncadd [#allocation4], 4294966784 }
  0xf1   :  { %168 = vsyncpa [#allocation3], 1 }
  0xf2   :  { %169 = vsyncpa [#allocation6], 1 }
  0xf3   :  { %170 = vsyncpa [#allocation4], 1 }

</bundles_post_ra>
